<compile_context>
chip_gen: v7x
topology: tpu7x:2x2x1
jax: 0.10.0
libtpu: 0.0.40
codegen_flags: <defaults>
</compile_context>

<pallas_src>
import functools

import jax
import jax.numpy as jnp
from jax import lax
from jax.experimental import pallas as pl
from jax.experimental.pallas import tpu as pltpu

BN_EPS = 1e-5
# Per-buffer budget for the streamed x tile (padded bytes). ~8 MiB is good for
# v5e/v6e (128 MiB physical VMEM); shrink to ~4 MiB on v7x (64 MiB physical).
_X_BLOCK_BYTES = 8 * 1024 * 1024


def _round_up(v, m):
    return (v + m - 1) // m * m


def _pick_batch_tile(n, row_elems):
    """Batch tile so the double-buffered x block fits the byte budget (padded)."""
    row_bytes = _round_up(row_elems, 128) * 4           # lane-padded f32 row
    tb = max(1, _X_BLOCK_BYTES // row_bytes)
    if tb >= n:
        return n                                        # full batch in one block
    return max(8, (tb // 8) * 8)                        # sublane-aligned partial tiles


def _pick_finalize_rows(n_pad):
    """Row-block size for the tiled finalize (must divide n_pad)."""
    for cand in (512, 256, 128, 64, 32, 16, 8):
        if n_pad % cand == 0:
            return cand
    return n_pad


def _value_head_kernel(hw, n_valid, has_remainder, fin_rows,
                       x_ref, w_ref, gamma_ref, beta_ref,
                       w1_ref, b1_ref, w2_ref, b2_ref,
                       out_ref, flat_ref, sum_ref):
    """Fused ValueHead forward.

    x_ref    : (TB, C_in*HW) VMEM  -- lane-dense streamed batch tile
    w_ref    : (2, C_in)     SMEM  -- 1x1 conv weight (scalar reads)
    gamma_ref, beta_ref : (2,) SMEM -- BatchNorm affine params
    w1_ref   : (K_pad, H_pad) VMEM -- linear1 weight^T, zero-padded
    b1_ref   : (1, H_pad)    VMEM
    w2_ref   : (1, H_pad)    VMEM  -- linear2 weight, zero-padded
    b2_ref   : (1,)          SMEM
    out_ref  : (N_pad, 1)    VMEM  -- written only in the finalize step
    flat_ref : (N_pad, K_pad) VMEM scratch -- conv activation, PyTorch flatten order
    sum_ref  : (2,)          SMEM scratch -- running per-channel sums (BN mean)
    """
    i = pl.program_id(0)
    n_tiles = pl.num_programs(0)
    tb = x_ref.shape[0]
    c_in = w_ref.shape[1]
    n_pad, k_pad = flat_ref.shape

    @pl.when(i == 0)
    def _():
        sum_ref[0] = jnp.float32(0.0)
        sum_ref[1] = jnp.float32(0.0)

    # --- 1x1 conv: unrolled VPU MACs over channel slices of the lane-dense x.
    # Each input-channel slice is loaded once and reused for both out channels.
    acc0 = None
    acc1 = None
    for c in range(c_in):
        xc = x_ref[:, c * hw:(c + 1) * hw]              # (TB, HW)
        t0 = w_ref[0, c] * xc
        t1 = w_ref[1, c] * xc
        acc0 = t0 if acc0 is None else acc0 + t0
        acc1 = t1 if acc1 is None else acc1 + t1

    # Zero rows past the real batch (only when the last tile is padded; decided
    # at trace time). Must stay ahead of the BN sum accumulation below.
    if has_remainder:
        row = lax.broadcasted_iota(jnp.int32, (tb, hw), 0) + i * tb
        valid = row < n_valid
        acc0 = jnp.where(valid, acc0, 0.0)
        acc1 = jnp.where(valid, acc1, 0.0)

    # --- Per-channel BN sums accumulated while values are still in vregs
    # (XLU reduce; hides under the HBM->VMEM x DMA in this mem-bound kernel).
    sum_ref[0] = sum_ref[0] + jnp.sum(acc0)
    sum_ref[1] = sum_ref[1] + jnp.sum(acc1)

    # --- Store the conv activation in PyTorch flatten order (c*HW + p),
    # concatenated into one lane-dense slab (padded lanes zeroed).
    parts = [acc0, acc1]
    if k_pad > 2 * hw:
        parts.append(jnp.zeros((tb, k_pad - 2 * hw), jnp.float32))
    start = pl.multiple_of(i * tb, tb)
    flat_ref[pl.ds(start, tb), :] = jnp.concatenate(parts, axis=1)

    # --- Finalize: BN variance + normalize + ReLU + MLP + tanh, tiled by rows.
    @pl.when(i == n_tiles - 1)
    def _():
        inv_total = 1.0 / float(n_valid * hw)
        mean0 = sum_ref[0] * inv_total
        mean1 = sum_ref[1] * inv_total

        lane = lax.broadcasted_iota(jnp.int32, (fin_rows, k_pad), 1)
        is_c0 = lane < hw
        is_c1 = (lane >= hw) & (lane < 2 * hw)
        mean_l = jnp.where(is_c0, mean0, jnp.where(is_c1, mean1, 0.0))

        n_blocks = n_pad // fin_rows

        # Pass 1: centered (two-pass, numerically safe) per-channel variance.
        def var_body(b, carry):
            v0, v1 = carry
            st = pl.multiple_of(b * fin_rows, fin_rows)
            blk = flat_ref[pl.ds(st, fin_rows), :]
            cent = blk - mean_l
            if has_remainder:
                row = lax.broadcasted_iota(jnp.int32, blk.shape, 0) + st
                cent = jnp.where(row < n_valid, cent, 0.0)
            sq = cent * cent
            v0 = v0 + jnp.sum(jnp.where(is_c0, sq, 0.0))
            v1 = v1 + jnp.sum(jnp.where(is_c1, sq, 0.0))
            return v0, v1

        var0, var1 = lax.fori_loop(0, n_blocks, var_body,
                                   (jnp.float32(0.0), jnp.float32(0.0)))
        var0 = var0 * inv_total                          # biased (training-mode BN)
        var1 = var1 * inv_total

        s0 = gamma_ref[0] * lax.rsqrt(var0 + BN_EPS)
        s1 = gamma_ref[1] * lax.rsqrt(var1 + BN_EPS)
        sh0 = beta_ref[0] - s0 * mean0
        sh1 = beta_ref[1] - s1 * mean1
        scale_l = jnp.where(is_c0, s0, jnp.where(is_c1, s1, 0.0))
        shift_l = jnp.where(is_c0, sh0, jnp.where(is_c1, sh1, 0.0))

        w1 = w1_ref[...]                                 # (K_pad, H_pad), resident
        b1 = b1_ref[...]                                 # (1, H_pad)
        w2 = w2_ref[...]                                 # (1, H_pad)
        b2 = b2_ref[0]

        # Pass 2: normalize -> ReLU -> MXU matmul -> ReLU -> linear2 -> tanh,
        # one lane-dense row block at a time (bounds VMEM temporaries).
        def mlp_body(b, carry):
            st = pl.multiple_of(b * fin_rows, fin_rows)
            blk = flat_ref[pl.ds(st, fin_rows), :]
            y = jnp.maximum(blk * scale_l + shift_l, 0.0)
            h = jnp.dot(y, w1, preferred_element_type=jnp.float32)
            h = jnp.maximum(h + b1, 0.0)                 # (fin_rows, H_pad)
            val = jnp.sum(h * w2, axis=1, keepdims=True) + b2
            out_ref[pl.ds(st, fin_rows), :] = jnp.tanh(val)
            return carry

        lax.fori_loop(0, n_blocks, mlp_body, 0)


@jax.jit
def value_head_forward(x_nchw, params):
    """Forward pass of ValueHead. x_nchw: (N, C_in, H, W) float32 -> (N, 1)."""
    n, c_in, h, w = x_nchw.shape
    hw = h * w
    k = 2 * hw
    hidden = params["w1"].shape[0]                       # 64
    k_pad = _round_up(k, 128)
    h_pad = _round_up(hidden, 128)

    # Free reshape only (no transpose): NCHW -> (N, C_in*HW), lane-dense stream.
    x2 = x_nchw.reshape(n, c_in * hw)

    tb = _pick_batch_tile(n, c_in * hw)
    n_tiles = pl.cdiv(n, tb)
    n_pad = tb * n_tiles
    has_remainder = (n % tb) != 0
    fin_rows = _pick_finalize_rows(n_pad)

    conv_w = params["conv_w"]                            # (2, C_in)
    gamma = params["bn_gamma"]                           # (2,)
    beta = params["bn_beta"]                             # (2,)
    # Zero-pad K and hidden to 128 multiples -> lane-dense MXU / reduces.
    w1_t = jnp.zeros((k_pad, h_pad), jnp.float32).at[:k, :hidden].set(params["w1"].T)
    b1 = jnp.zeros((1, h_pad), jnp.float32).at[:, :hidden].set(params["b1"])
    w2 = jnp.zeros((1, h_pad), jnp.float32).at[:, :hidden].set(
        params["w2"].reshape(1, hidden))
    b2 = params["b2"].reshape(1)

    # Explicit VMEM budget from the *padded* footprint (+ headroom).
    xblk_bytes = _round_up(tb, 8) * _round_up(c_in * hw, 128) * 4
    flat_bytes = _round_up(n_pad, 8) * k_pad * 4
    w1_bytes = k_pad * h_pad * 4
    out_bytes = _round_up(n_pad, 8) * 128 * 4
    vmem_limit = min(2 * xblk_bytes + flat_bytes + 2 * w1_bytes + 2 * out_bytes
                     + (8 << 20), 120 << 20)

    smem = pl.BlockSpec(memory_space=pltpu.MemorySpace.SMEM)
    kernel = functools.partial(_value_head_kernel, hw, n, has_remainder, fin_rows)
    grid_spec = pltpu.PrefetchScalarGridSpec(
        num_scalar_prefetch=0,
        grid=(n_tiles,),
        in_specs=[
            pl.BlockSpec((tb, c_in * hw), lambda i: (i, 0)),   # x tile (streamed)
            smem,                                              # conv weight
            smem,                                              # gamma
            smem,                                              # beta
            pl.BlockSpec((k_pad, h_pad), lambda i: (0, 0)),    # w1^T (resident)
            pl.BlockSpec((1, h_pad), lambda i: (0, 0)),        # b1
            pl.BlockSpec((1, h_pad), lambda i: (0, 0)),        # w2
            smem,                                              # b2
        ],
        out_specs=pl.BlockSpec((n_pad, 1), lambda i: (0, 0)),
        scratch_shapes=[
            pltpu.VMEM((n_pad, k_pad), jnp.float32),           # flat activation
            pltpu.SMEM((2,), jnp.float32),                     # per-channel sums
        ],
    )
    out_pad = pl.pallas_call(
        kernel,
        out_shape=jax.ShapeDtypeStruct((n_pad, 1), jnp.float32),
        grid_spec=grid_spec,
        compiler_params=pltpu.CompilerParams(
            # Single grid axis carries BN stat accumulation + finalize.
            dimension_semantics=("arbitrary",),
            vmem_limit_bytes=int(vmem_limit),
        ),
    )(x2, conv_w, gamma, beta, w1_t, b1, w2, b2)
    return out_pad[:n]


def init_params(key, in_channels, board_size):
    """Deterministic synthetic parameters matching ValueHead.__init__ shapes."""
    k = jax.random.split(key, 5)
    hw2 = board_size * board_size * 2
    return dict(
        conv_w=jax.random.normal(k[0], (2, in_channels), jnp.float32) * 0.1,
        bn_gamma=1.0 + 0.1 * jax.random.normal(k[1], (2,), jnp.float32),
        bn_beta=0.1 * jax.random.normal(k[2], (2,), jnp.float32),
        w1=jax.random.normal(k[3], (64, hw2), jnp.float32) / jnp.sqrt(hw2),
        b1=0.01 * jnp.arange(64, dtype=jnp.float32),
        w2=jax.random.normal(k[4], (1, 64), jnp.float32) * 0.125,
        b2=jnp.array([0.05], jnp.float32),
    )


def value_head_reference(x_nchw, params):
    """Pure-JAX reference reproducing PyTorch ValueHead.forward (training-mode BN)."""
    n = x_nchw.shape[0]
    conv = jnp.einsum("oc,nchw->nohw", params["conv_w"], x_nchw)
    mean = conv.mean(axis=(0, 2, 3), keepdims=True)
    var = conv.var(axis=(0, 2, 3), keepdims=True)
    y = params["bn_gamma"].reshape(1, 2, 1, 1) * (conv - mean) / jnp.sqrt(var + BN_EPS) \
        + params["bn_beta"].reshape(1, 2, 1, 1)
    y = jnp.maximum(y, 0.0)
    flat = y.reshape(n, -1)
    h = jnp.maximum(flat @ params["w1"].T + params["b1"], 0.0)
    return jnp.tanh(h @ params["w2"].T + params["b2"])


if __name__ == "__main__":
    key = jax.random.PRNGKey(0)
    in_channels, board_size, batch = 4, 8, 2
    kx, kp = jax.random.split(key)
    x = jax.random.normal(kx, (batch, in_channels, board_size, board_size), jnp.float32)
    params = init_params(kp, in_channels, board_size)

    out = jax.block_until_ready(value_head_forward(x, params))
    ref = value_head_reference(x, params)

    assert out.shape == (batch, 1), out.shape
    assert jnp.allclose(out, ref, atol=1e-5, rtol=1e-5), (out, ref)
    print("KERNEL_OK")
</pallas_src>

<mosaic_0001>
module attributes {stable_mosaic.version = 11 : i64} {
  func.func @_value_head_kernel(%arg0: i32, %arg1: memref<2x256xf32, #tpu.memory_space<vmem>>, %arg2: memref<2x4xf32, #tpu.memory_space<smem>>, %arg3: memref<2xf32, #tpu.memory_space<smem>>, %arg4: memref<2xf32, #tpu.memory_space<smem>>, %arg5: memref<128x128xf32, #tpu.memory_space<vmem>>, %arg6: memref<1x128xf32, #tpu.memory_space<vmem>>, %arg7: memref<1x128xf32, #tpu.memory_space<vmem>>, %arg8: memref<1xf32, #tpu.memory_space<smem>>, %arg9: memref<2x1xf32, #tpu.memory_space<vmem>>, %arg10: memref<2x128xf32, #tpu.memory_space<vmem>>, %arg11: memref<2xf32, #tpu.memory_space<smem>>) attributes {dimension_semantics = [#tpu.dimension_semantics<arbitrary>], iteration_bounds = array<i64: 1>, scalar_prefetch = 0 : i64, scratch_operands = 2 : i64, tpu.core_type = #tpu.core_type<tc>, window_params = [{transform_indices = @transform_0, window_bounds = array<i64: 2, 256>}, {transform_indices = @transform_1, window_bounds = array<i64: 2, 4>}, {transform_indices = @transform_2, window_bounds = array<i64: 2>}, {transform_indices = @transform_3, window_bounds = array<i64: 2>}, {pipeline_mode = #tpu.pipeline_mode<synchronous>, transform_indices = @transform_4, window_bounds = array<i64: 128, 128>}, {pipeline_mode = #tpu.pipeline_mode<synchronous>, transform_indices = @transform_5, window_bounds = array<i64: 1, 128>}, {pipeline_mode = #tpu.pipeline_mode<synchronous>, transform_indices = @transform_6, window_bounds = array<i64: 1, 128>}, {transform_indices = @transform_7, window_bounds = array<i64: 1>}, {pipeline_mode = #tpu.pipeline_mode<synchronous>, transform_indices = @transform_8, window_bounds = array<i64: 2, 1>}]} {
    %c0_i32 = arith.constant 0 : i32
    %0 = arith.cmpi eq, %arg0, %c0_i32 : i32
    %1 = arith.extui %0 : i1 to i32
    %c0_i32_0 = arith.constant 0 : i32
    %2 = arith.cmpi ne, %1, %c0_i32_0 : i32
    scf.if %2 {
      %cst_26 = arith.constant 0.000000e+00 : f32
      %c0_27 = arith.constant 0 : index
      %59 = memref.load %arg11[%c0_27] : memref<2xf32, #tpu.memory_space<smem>>
      memref.store %cst_26, %arg11[%c0_27] : memref<2xf32, #tpu.memory_space<smem>>
      %cst_28 = arith.constant 0.000000e+00 : f32
      %c1_29 = arith.constant 1 : index
      %60 = memref.load %arg11[%c1_29] : memref<2xf32, #tpu.memory_space<smem>>
      memref.store %cst_28, %arg11[%c1_29] : memref<2xf32, #tpu.memory_space<smem>>
    } else {
    }
    %c0 = arith.constant 0 : index
    %c0_1 = arith.constant 0 : index
    %3 = vector.load %arg1[%c0, %c0_1] : memref<2x256xf32, #tpu.memory_space<vmem>>, vector<2x64xf32>
    %c0_2 = arith.constant 0 : index
    %c0_3 = arith.constant 0 : index
    %4 = memref.load %arg2[%c0_2, %c0_3] : memref<2x4xf32, #tpu.memory_space<smem>>
    %5 = vector.broadcast %4 : f32 to vector<2x64xf32>
    %6 = arith.mulf %5, %3 : vector<2x64xf32>
    %c1 = arith.constant 1 : index
    %c0_4 = arith.constant 0 : index
    %7 = memref.load %arg2[%c1, %c0_4] : memref<2x4xf32, #tpu.memory_space<smem>>
    %8 = vector.broadcast %7 : f32 to vector<2x64xf32>
    %9 = arith.mulf %8, %3 : vector<2x64xf32>
    %c0_5 = arith.constant 0 : index
    %c64 = arith.constant 64 : index
    %10 = vector.load %arg1[%c0_5, %c64] : memref<2x256xf32, #tpu.memory_space<vmem>>, vector<2x64xf32>
    %c0_6 = arith.constant 0 : index
    %c1_7 = arith.constant 1 : index
    %11 = memref.load %arg2[%c0_6, %c1_7] : memref<2x4xf32, #tpu.memory_space<smem>>
    %12 = vector.broadcast %11 : f32 to vector<2x64xf32>
    %13 = arith.mulf %12, %10 : vector<2x64xf32>
    %c1_8 = arith.constant 1 : index
    %c1_9 = arith.constant 1 : index
    %14 = memref.load %arg2[%c1_8, %c1_9] : memref<2x4xf32, #tpu.memory_space<smem>>
    %15 = vector.broadcast %14 : f32 to vector<2x64xf32>
    %16 = arith.mulf %15, %10 : vector<2x64xf32>
    %17 = arith.addf %6, %13 : vector<2x64xf32>
    %18 = arith.addf %9, %16 : vector<2x64xf32>
    %c0_10 = arith.constant 0 : index
    %c128 = arith.constant 128 : index
    %19 = vector.load %arg1[%c0_10, %c128] : memref<2x256xf32, #tpu.memory_space<vmem>>, vector<2x64xf32>
    %c0_11 = arith.constant 0 : index
    %c2 = arith.constant 2 : index
    %20 = memref.load %arg2[%c0_11, %c2] : memref<2x4xf32, #tpu.memory_space<smem>>
    %21 = vector.broadcast %20 : f32 to vector<2x64xf32>
    %22 = arith.mulf %21, %19 : vector<2x64xf32>
    %c1_12 = arith.constant 1 : index
    %c2_13 = arith.constant 2 : index
    %23 = memref.load %arg2[%c1_12, %c2_13] : memref<2x4xf32, #tpu.memory_space<smem>>
    %24 = vector.broadcast %23 : f32 to vector<2x64xf32>
    %25 = arith.mulf %24, %19 : vector<2x64xf32>
    %26 = arith.addf %17, %22 : vector<2x64xf32>
    %27 = arith.addf %18, %25 : vector<2x64xf32>
    %c0_14 = arith.constant 0 : index
    %c192 = arith.constant 192 : index
    %28 = vector.load %arg1[%c0_14, %c192] : memref<2x256xf32, #tpu.memory_space<vmem>>, vector<2x64xf32>
    %c0_15 = arith.constant 0 : index
    %c3 = arith.constant 3 : index
    %29 = memref.load %arg2[%c0_15, %c3] : memref<2x4xf32, #tpu.memory_space<smem>>
    %30 = vector.broadcast %29 : f32 to vector<2x64xf32>
    %31 = arith.mulf %30, %28 : vector<2x64xf32>
    %c1_16 = arith.constant 1 : index
    %c3_17 = arith.constant 3 : index
    %32 = memref.load %arg2[%c1_16, %c3_17] : memref<2x4xf32, #tpu.memory_space<smem>>
    %33 = vector.broadcast %32 : f32 to vector<2x64xf32>
    %34 = arith.mulf %33, %28 : vector<2x64xf32>
    %35 = arith.addf %26, %31 : vector<2x64xf32>
    %36 = arith.addf %27, %34 : vector<2x64xf32>
    %c0_18 = arith.constant 0 : index
    %37 = memref.load %arg11[%c0_18] : memref<2xf32, #tpu.memory_space<smem>>
    %38 = vector.shape_cast %35 : vector<2x64xf32> to vector<1x2x64xf32>
    %cst = arith.constant dense<0.000000e+00> : vector<1xf32>
    %39 = vector.multi_reduction <add>, %38, %cst [1, 2] : vector<1x2x64xf32> to vector<1xf32>
    %40 = vector.shape_cast %39 : vector<1xf32> to vector<1x1x1xf32>
    %41 = vector.extract %40[0, 0, 0] : f32 from vector<1x1x1xf32>
    %42 = arith.addf %37, %41 : f32
    %c0_19 = arith.constant 0 : index
    %43 = memref.load %arg11[%c0_19] : memref<2xf32, #tpu.memory_space<smem>>
    memref.store %42, %arg11[%c0_19] : memref<2xf32, #tpu.memory_space<smem>>
    %c1_20 = arith.constant 1 : index
    %44 = memref.load %arg11[%c1_20] : memref<2xf32, #tpu.memory_space<smem>>
    %45 = vector.shape_cast %36 : vector<2x64xf32> to vector<1x2x64xf32>
    %cst_21 = arith.constant dense<0.000000e+00> : vector<1xf32>
    %46 = vector.multi_reduction <add>, %45, %cst_21 [1, 2] : vector<1x2x64xf32> to vector<1xf32>
    %47 = vector.shape_cast %46 : vector<1xf32> to vector<1x1x1xf32>
    %48 = vector.extract %47[0, 0, 0] : f32 from vector<1x1x1xf32>
    %49 = arith.addf %44, %48 : f32
    %c1_22 = arith.constant 1 : index
    %50 = memref.load %arg11[%c1_22] : memref<2xf32, #tpu.memory_space<smem>>
    memref.store %49, %arg11[%c1_22] : memref<2xf32, #tpu.memory_space<smem>>
    %c2_i32 = arith.constant 2 : i32
    %51 = arith.muli %arg0, %c2_i32 : i32
    %52 = tpu.assume_multiple %51, 2 : i32
    %53 = tpu.concatenate %35, %36 in 1 : vector<2x64xf32>, vector<2x64xf32> -> vector<2x128xf32>
    %54 = arith.index_cast %52 : i32 to index
    %c0_23 = arith.constant 0 : index
    %55 = vector.load %arg10[%54, %c0_23] : memref<2x128xf32, #tpu.memory_space<vmem>>, vector<2x128xf32>
    tpu.vector_store %arg10[%54, %c0_23], %53 {strides = array<i32>} : memref<2x128xf32, #tpu.memory_space<vmem>>, vector<2x128xf32>,
    %c0_i32_24 = arith.constant 0 : i32
    %56 = arith.cmpi eq, %arg0, %c0_i32_24 : i32
    %57 = arith.extui %56 : i1 to i32
    %c0_i32_25 = arith.constant 0 : i32
    %58 = arith.cmpi ne, %57, %c0_i32_25 : i32
    scf.if %58 {
      %c0_26 = arith.constant 0 : index
      %59 = memref.load %arg11[%c0_26] : memref<2xf32, #tpu.memory_space<smem>>
      %cst_27 = arith.constant 7.812500e-03 : f32
      %60 = arith.mulf %59, %cst_27 : f32
      %c1_28 = arith.constant 1 : index
      %61 = memref.load %arg11[%c1_28] : memref<2xf32, #tpu.memory_space<smem>>
      %cst_29 = arith.constant 7.812500e-03 : f32
      %62 = arith.mulf %61, %cst_29 : f32
      %63 = tpu.iota {dimensions = array<i32: 1>} : vector<2x128xi32>
      %c64_i32 = arith.constant 64 : i32
      %64 = vector.broadcast %c64_i32 : i32 to vector<2x128xi32>
      %65 = arith.cmpi slt, %63, %64 : vector<2x128xi32>
      %c64_i32_30 = arith.constant 64 : i32
      %66 = vector.broadcast %c64_i32_30 : i32 to vector<2x128xi32>
      %67 = arith.cmpi sge, %63, %66 : vector<2x128xi32>
      %c128_i32 = arith.constant 128 : i32
      %68 = vector.broadcast %c128_i32 : i32 to vector<2x128xi32>
      %69 = arith.cmpi slt, %63, %68 : vector<2x128xi32>
      %70 = arith.andi %67, %69 : vector<2x128xi1>
      %cst_31 = arith.constant 0.000000e+00 : f32
      %71 = vector.broadcast %62 : f32 to vector<2x128xf32>
      %72 = vector.broadcast %cst_31 : f32 to vector<2x128xf32>
      %73 = arith.select %70, %71, %72 : vector<2x128xi1>, vector<2x128xf32>
      %74 = vector.broadcast %60 : f32 to vector<2x128xf32>
      %75 = arith.select %65, %74, %73 : vector<2x128xi1>, vector<2x128xf32>
      %cst_32 = arith.constant 0.000000e+00 : f32
      %cst_33 = arith.constant 0.000000e+00 : f32
      %c0_i32_34 = arith.constant 0 : i32
      %c2_i32_35 = arith.constant 2 : i32
      %76 = arith.muli %c0_i32_34, %c2_i32_35 : i32
      %77 = tpu.assume_multiple %76, 2 : i32
      %78 = arith.index_cast %77 : i32 to index
      %c0_36 = arith.constant 0 : index
      %79 = vector.load %arg10[%78, %c0_36] : memref<2x128xf32, #tpu.memory_space<vmem>>, vector<2x128xf32>
      %80 = arith.subf %79, %75 : vector<2x128xf32>
      %81 = arith.mulf %80, %80 : vector<2x128xf32>
      %cst_37 = arith.constant 0.000000e+00 : f32
      %82 = vector.broadcast %cst_37 : f32 to vector<2x128xf32>
      %83 = arith.select %65, %81, %82 : vector<2x128xi1>, vector<2x128xf32>
      %84 = vector.shape_cast %83 : vector<2x128xf32> to vector<1x2x128xf32>
      %cst_38 = arith.constant dense<0.000000e+00> : vector<1xf32>
      %85 = vector.multi_reduction <add>, %84, %cst_38 [1, 2] : vector<1x2x128xf32> to vector<1xf32>
      %86 = vector.shape_cast %85 : vector<1xf32> to vector<1x1x1xf32>
      %87 = vector.extract %86[0, 0, 0] : f32 from vector<1x1x1xf32>
      %88 = arith.addf %cst_32, %87 : f32
      %cst_39 = arith.constant 0.000000e+00 : f32
      %89 = vector.broadcast %cst_39 : f32 to vector<2x128xf32>
      %90 = arith.select %70, %81, %89 : vector<2x128xi1>, vector<2x128xf32>
      %91 = vector.shape_cast %90 : vector<2x128xf32> to vector<1x2x128xf32>
      %cst_40 = arith.constant dense<0.000000e+00> : vector<1xf32>
      %92 = vector.multi_reduction <add>, %91, %cst_40 [1, 2] : vector<1x2x128xf32> to vector<1xf32>
      %93 = vector.shape_cast %92 : vector<1xf32> to vector<1x1x1xf32>
      %94 = vector.extract %93[0, 0, 0] : f32 from vector<1x1x1xf32>
      %95 = arith.addf %cst_33, %94 : f32
      %c1_i32 = arith.constant 1 : i32
      %cst_41 = arith.constant 7.812500e-03 : f32
      %96 = arith.mulf %88, %cst_41 : f32
      %cst_42 = arith.constant 7.812500e-03 : f32
      %97 = arith.mulf %95, %cst_42 : f32
      %c0_43 = arith.constant 0 : index
      %98 = memref.load %arg3[%c0_43] : memref<2xf32, #tpu.memory_space<smem>>
      %cst_44 = arith.constant 9.99999974E-6 : f32
      %99 = arith.addf %96, %cst_44 : f32
      %100 = math.rsqrt %99 : f32
      %101 = arith.mulf %98, %100 : f32
      %c1_45 = arith.constant 1 : index
      %102 = memref.load %arg3[%c1_45] : memref<2xf32, #tpu.memory_space<smem>>
      %cst_46 = arith.constant 9.99999974E-6 : f32
      %103 = arith.addf %97, %cst_46 : f32
      %104 = math.rsqrt %103 : f32
      %105 = arith.mulf %102, %104 : f32
      %c0_47 = arith.constant 0 : index
      %106 = memref.load %arg4[%c0_47] : memref<2xf32, #tpu.memory_space<smem>>
      %107 = arith.mulf %101, %60 : f32
      %108 = arith.subf %106, %107 : f32
      %c1_48 = arith.constant 1 : index
      %109 = memref.load %arg4[%c1_48] : memref<2xf32, #tpu.memory_space<smem>>
      %110 = arith.mulf %105, %62 : f32
      %111 = arith.subf %109, %110 : f32
      %cst_49 = arith.constant 0.000000e+00 : f32
      %112 = vector.broadcast %105 : f32 to vector<2x128xf32>
      %113 = vector.broadcast %cst_49 : f32 to vector<2x128xf32>
      %114 = arith.select %70, %112, %113 : vector<2x128xi1>, vector<2x128xf32>
      %115 = vector.broadcast %101 : f32 to vector<2x128xf32>
      %116 = arith.select %65, %115, %114 : vector<2x128xi1>, vector<2x128xf32>
      %cst_50 = arith.constant 0.000000e+00 : f32
      %117 = vector.broadcast %111 : f32 to vector<2x128xf32>
      %118 = vector.broadcast %cst_50 : f32 to vector<2x128xf32>
      %119 = arith.select %70, %117, %118 : vector<2x128xi1>, vector<2x128xf32>
      %120 = vector.broadcast %108 : f32 to vector<2x128xf32>
      %121 = arith.select %65, %120, %119 : vector<2x128xi1>, vector<2x128xf32>
      %c0_51 = arith.constant 0 : index
      %c0_52 = arith.constant 0 : index
      %122 = vector.load %arg5[%c0_51, %c0_52] : memref<128x128xf32, #tpu.memory_space<vmem>>, vector<128x128xf32>
      %c0_53 = arith.constant 0 : index
      %c0_54 = arith.constant 0 : index
      %123 = vector.load %arg6[%c0_53, %c0_54] : memref<1x128xf32, #tpu.memory_space<vmem>>, vector<1x128xf32>
      %c0_55 = arith.constant 0 : index
      %c0_56 = arith.constant 0 : index
      %124 = vector.load %arg7[%c0_55, %c0_56] : memref<1x128xf32, #tpu.memory_space<vmem>>, vector<1x128xf32>
      %c0_57 = arith.constant 0 : index
      %125 = memref.load %arg8[%c0_57] : memref<1xf32, #tpu.memory_space<smem>>
      %c0_i32_58 = arith.constant 0 : i32
      %c2_i32_59 = arith.constant 2 : i32
      %126 = arith.muli %c0_i32_58, %c2_i32_59 : i32
      %127 = tpu.assume_multiple %126, 2 : i32
      %128 = arith.index_cast %127 : i32 to index
      %c0_60 = arith.constant 0 : index
      %129 = vector.load %arg10[%128, %c0_60] : memref<2x128xf32, #tpu.memory_space<vmem>>, vector<2x128xf32>
      %130 = arith.mulf %129, %116 : vector<2x128xf32>
      %131 = arith.addf %130, %121 : vector<2x128xf32>
      %cst_61 = arith.constant 0.000000e+00 : f32
      %132 = vector.broadcast %cst_61 : f32 to vector<2x128xf32>
      %133 = arith.maximumf %131, %132 : vector<2x128xf32>
      %cst_62 = arith.constant dense<0.000000e+00> : vector<2x128xf32>
      %134 = tpu.matmul %133, %122, %cst_62 {dimension_numbers = #tpu.dot_dimension_numbers<[1], [0], [0], [1], [0, 0, 1, 1], [], []>} : vector<2x128xf32>, vector<128x128xf32>, vector<2x128xf32> -> vector<2x128xf32>
      %135 = vector.broadcast %123 : vector<1x128xf32> to vector<2x128xf32>
      %136 = arith.addf %134, %135 : vector<2x128xf32>
      %cst_63 = arith.constant 0.000000e+00 : f32
      %137 = vector.broadcast %cst_63 : f32 to vector<2x128xf32>
      %138 = arith.maximumf %136, %137 : vector<2x128xf32>
      %139 = vector.broadcast %124 : vector<1x128xf32> to vector<2x128xf32>
      %140 = arith.mulf %138, %139 : vector<2x128xf32>
      %cst_64 = arith.constant dense<0.000000e+00> : vector<2xf32>
      %141 = vector.multi_reduction <add>, %140, %cst_64 [1] : vector<2x128xf32> to vector<2xf32>
      %142 = vector.shape_cast %141 : vector<2xf32> to vector<2x1xf32>
      %143 = vector.broadcast %125 : f32 to vector<2x1xf32>
      %144 = arith.addf %142, %143 : vector<2x1xf32>
      %145 = math.tanh %144 : vector<2x1xf32>
      %146 = arith.index_cast %127 : i32 to index
      %c0_65 = arith.constant 0 : index
      %147 = vector.load %arg9[%146, %c0_65] : memref<2x1xf32, #tpu.memory_space<vmem>>, vector<2x1xf32>
      tpu.vector_store %arg9[%146, %c0_65], %145 {strides = array<i32>} : memref<2x1xf32, #tpu.memory_space<vmem>>, vector<2x1xf32>,
      %c1_i32_66 = arith.constant 1 : i32
    } else {
    }
    return
  }
  func.func @transform_0(%arg0: i32) -> (i32, i32) {
    %c0_i32 = arith.constant 0 : i32
    %c0_i32_0 = arith.constant 0 : i32
    return %arg0, %c0_i32 : i32, i32
  }
  func.func @transform_1(%arg0: i32) -> (i32, i32) {
    %c0_i32 = arith.constant 0 : i32
    %c0_i32_0 = arith.constant 0 : i32
    %c0_i32_1 = arith.constant 0 : i32
    return %c0_i32, %c0_i32_0 : i32, i32
  }
  func.func @transform_2(%arg0: i32) -> i32 {
    %c0_i32 = arith.constant 0 : i32
    %c0_i32_0 = arith.constant 0 : i32
    return %c0_i32 : i32
  }
  func.func @transform_3(%arg0: i32) -> i32 {
    %c0_i32 = arith.constant 0 : i32
    %c0_i32_0 = arith.constant 0 : i32
    return %c0_i32 : i32
  }
  func.func @transform_4(%arg0: i32) -> (i32, i32) {
    %c0_i32 = arith.constant 0 : i32
    %c0_i32_0 = arith.constant 0 : i32
    %c0_i32_1 = arith.constant 0 : i32
    return %c0_i32, %c0_i32_0 : i32, i32
  }
  func.func @transform_5(%arg0: i32) -> (i32, i32) {
    %c0_i32 = arith.constant 0 : i32
    %c0_i32_0 = arith.constant 0 : i32
    %c0_i32_1 = arith.constant 0 : i32
    return %c0_i32, %c0_i32_0 : i32, i32
  }
  func.func @transform_6(%arg0: i32) -> (i32, i32) {
    %c0_i32 = arith.constant 0 : i32
    %c0_i32_0 = arith.constant 0 : i32
    %c0_i32_1 = arith.constant 0 : i32
    return %c0_i32, %c0_i32_0 : i32, i32
  }
  func.func @transform_7(%arg0: i32) -> i32 {
    %c0_i32 = arith.constant 0 : i32
    %c0_i32_0 = arith.constant 0 : i32
    return %c0_i32 : i32
  }
  func.func @transform_8(%arg0: i32) -> (i32, i32) {
    %c0_i32 = arith.constant 0 : i32
    %c0_i32_0 = arith.constant 0 : i32
    %c0_i32_1 = arith.constant 0 : i32
    return %c0_i32, %c0_i32_0 : i32, i32
  }
}

</mosaic_0001>

<bundles_post_ra>
// kernel: value_head_forward.1
= control target key start
LH: loop header
LB: loop body
LE: loop exit
PB: predicated region body
PF: predicated region fallthrough
CT: control target
= control target key end

     0   :  { %14 = vsyncpa [#allocation6], 0  ;;  %s689_s0 = inlined_call_operand.vmem [shape: f32[2,256], index: 0, kind: input, shape index: {}]   ;;  %s690_s1 = inlined_call_operand.vmem [shape: f32[2,4], index: 1, kind: input, shape index: {}]   ;;  %s691_s2 = inlined_call_operand.vmem [shape: f32[2], index: 2, kind: input, shape index: {}]   ;;  %s692_s3 = inlined_call_operand.vmem [shape: f32[2], index: 3, kind: input, shape index: {}]   ;;  %s693_s4 = inlined_call_operand.vmem [shape: f32[128,128], index: 4, kind: input, shape index: {}]   ;;  %s694_s5 = inlined_call_operand.vmem [shape: f32[1,128], index: 5, kind: input, shape index: {}]   ;;  %s695_s6 = inlined_call_operand.vmem [shape: f32[1,128], index: 6, kind: input, shape index: {}]   ;;  %s696_s7 = inlined_call_operand.<no memory space> [shape: f32[1], index: 7, kind: input, shape index: {}]   ;;  %s697_s8 = inlined_call_operand.vmem [shape: f32[2,1], index: 8, kind: output, shape index: {}]  }
   0x1   :  { %15 = vsyncpa [#allocation8], 0  ;;  %s34_s29 = sshll.u32 %s691_s2, 4  ;;  %s24_s10 = sshll.u32 %s690_s1, 4  ;;  %s35_s29 = int_to_ptr.vmem [resolvable:$true] %s34_s29  ;;  %s25_s10 = int_to_ptr.vmem [resolvable:$true] %s24_s10 }
   0x2   :  { %s475_s11 = scalar_lea.vmem %s35_s29, 16  ;;  %p480_p1 = scmp.lt.s32.totalorder %s35_s29, %s35_s29 }
   0x3   :  { %p476_p0 = scmp.ne.s32.totalorder %s35_s29, %s475_s11  ;;  %p481_p2 = scmp.lt.s32.totalorder %s475_s11, %s475_s11 }
   0x5   :  { %p482_p3 = por %p481_p2, %p480_p1 }
   0x7   :  { %p483_p4 = pnand %p482_p3, %p476_p0 }
   0x9   :  { %486 = shalt.err (!%p483_p4)
}
   0xa   :  { %s515_s12 = smov [#allocation7]   ;;  %s487_s13 = scalar_lea.vmem %s25_s10, 32 }
   0xb   :  { %37 = dma.vmem_to_smem %s35_s29, 16, %s515_s12, [#allocation8]  }
   0xc   :  { %p488_p5 = scmp.ne.s32.totalorder %s25_s10, %s487_s13  ;;  %p492_p6 = scmp.lt.s32.totalorder %s25_s10, %s25_s10 }
   0xd   :  { %p493_p7 = scmp.lt.s32.totalorder %s487_s13, %s487_s13 }
   0xf   :  { %p494_p8 = por %p493_p7, %p492_p6 }
  0x11   :  { %p495_p9 = pnand %p494_p8, %p488_p5 }
  0x13   :  { %498 = shalt.err (!%p495_p9)
}
  0x14   :  { %s516_s2 = smov [#allocation5]   ;;  %s44_s15 = sshll.u32 %s692_s3, 4  ;;  %s45_s15 = int_to_ptr.vmem [resolvable:$true] %s44_s15 }
  0x15   :  { %27 = dma.vmem_to_smem %s25_s10, 32, %s516_s2, [#allocation6]  }
  0x16   :  { %s499_s16 = scalar_lea.vmem %s45_s15, 16  ;;  %p504_p11 = scmp.lt.s32.totalorder %s45_s15, %s45_s15 }
  0x17   :  { %p500_p10 = scmp.ne.s32.totalorder %s45_s15, %s499_s16  ;;  %p505_p12 = scmp.lt.s32.totalorder %s499_s16, %s499_s16 }
  0x19   :  { %p506_p13 = por %p505_p12, %p504_p11 }
  0x1b   :  { %p507_p0 = pnand %p506_p13, %p500_p10 }
  0x1d   :  { %510 = shalt.err (!%p507_p0)
}
  0x1e   :  { %s517_s17 = smov [#allocation9]  }
  0x1f   :  { %47 = dma.vmem_to_smem %s45_s15, 16, %s517_s17, [#allocation8]  }
  0x20   :  { %511 = dma.done.wait [#allocation6], 32  }
  0x21   :  { %512 = vsyncadd [#allocation6], 4294967264 }
  0x22   :  { %513 = dma.done.wait [#allocation8], 32  }
  0x23   :  { %514 = vsyncadd [#allocation8], 4294967264 }
  0x24   :  { %65 = sfence }
  0x25   :  { %s361_s18 = sld [smem:[#allocation5 + $0x1]]  ;;  %s365_s19 = sld [smem:[#allocation5 + $0x3]]  ;;  %v74_v0 = vld [vmem:[%s689_s0] sm:$0x3]  ;;  %v97_v1 = vld [vmem:[%s689_s0 + $0x2] sm:$0x3]  ;;  %v156_v32 = vlaneseq }
  0x26   :  { %s362_s20 = sld [smem:[#allocation5 + $0x81]]  ;;  %s366_s21 = sld [smem:[#allocation5 + $0x83]]  ;;  %vm123_vm0 = vcmask 517120   ;;  %v519_v30 = vmov 1983009808   ;;  %vm163_vm1 = vcmask 523264  }
  0x27   :  { %s518_s25 = smov 64   ;;  %s75_s26 = sld [smem:[#allocation5]]  ;;  %v154_v31 = vunpack.c.l.s4 %v519_v30  ;;  %v157_v34 = vshrl.u32 %v156_v32, 7  ;;  %v590_v53 = vand.u32 127, %v156_v32  ;;  %vm188_vm4 = vcmask 1041408  }
  0x28   :  { %s363_s27 = sld [smem:[#allocation5 + $0x2]]  ;;  %s360_s0 = sld [smem:[#allocation5 + $0x80]]  ;;  %vm521_vm5 = vmmov 0   ;;  %vm352_vm6 = vcmask 1024  }
  0x29   :  { %s364_s28 = sld [smem:[#allocation5 + $0x82]]  ;;  %v155_v33 = vunpack.c.0.s8 %v154_v31  ;;  %vm177_vm2 = vcmp.ge.s32.totalorder %v590_v53, 64  ;;  %vm176_vm3 = vcmp.lt.s32.totalorder %v590_v53, 64  ;;  %s369_s24 = sld [smem:[#allocation7 + $0x1]]  ;;  %v349_v53 = vstv %s696_s7 }
  0x2b   :  { %v82_v2 = vstv %s361_s18  ;;  %v107_v4 = vstv %s365_s19  ;;  %v158_v35 = vsub.s32 %v155_v33, %v157_v34 }
  0x2c   :  { %v83_v3 = vmul.f32 %v82_v2, %v74_v0  ;;  %v85_v5 = vstv %s362_s20  ;;  %v108_v6 = vmul.f32 %v107_v4, %v97_v1  ;;  %v110_v7 = vstv %s366_s21  ;;  %v241_v2 = vld [vmem:[%s693_s4 + $0x8] sm:$0xff] }
  0x2d   :  { %v86_v8 = vmul.f32 %v85_v5, %v74_v0  ;;  %v111_v9 = vmul.f32 %v110_v7, %v97_v1  ;;  %v76_v10 = vstv %s75_s26  ;;  %v520_v4 = vmov 0.0|0.0   ;;  %s226_s26 = sld [smem:[#allocation9]] }
  0x2e   :  { %88 = vrot.lane.b32.xlu0 %v83_v3, %s518_s25  ;;  %113 = vrot.lane.b32.xlu1 %v108_v6, %s518_s25  ;;  %v99_v11 = vstv %s363_s27  ;;  %v77_v12 = vmul.f32 %v76_v10, %v74_v0  ;;  %v79_v13 = vstv %s360_s0  ;;  %s370_s0 = sld [smem:[#allocation9 + $0x1]] }
  0x2f   :  { %v100_v14 = vmul.f32 %v99_v11, %v97_v1  ;;  %v102_v16 = vstv %s364_s28  ;;  %v80_v19 = vmul.f32 %v79_v13, %v74_v0  ;;  %v242_v3 = vld [vmem:[%s693_s4 + $0x10] sm:$0xff]  ;;  %425 = vmatprep.subr.bf16.mxu0 %v520_v4  ;;  %v243_v6 = vld [vmem:[%s693_s4 + $0x18] sm:$0xff] }
  0x30   :  { %v103_v21 = vmul.f32 %v102_v16, %v97_v1  ;;  %v240_v1 = vld [vmem:[%s693_s4] sm:$0xff]  ;;  %v429_v7 = vpack.c.bf16 %v243_v6, %v242_v3  ;;  %v246_v11 = vld [vmem:[%s693_s4 + $0x30] sm:$0xff]  ;;  %v249_v16 = vld [vmem:[%s693_s4 + $0x48] sm:$0xff] }
  0x31   :  { %v426_v5 = vpack.c.bf16 %v241_v2, %v240_v1 }
  0x32   :  { %93 = vrot.lane.b32.xlu0 %v86_v8, %s518_s25  ;;  %118 = vrot.lane.b32.xlu1 %v111_v9, %s518_s25  ;;  %v244_v8 = vld [vmem:[%s693_s4 + $0x20] sm:$0xff]  ;;  %v245_v9 = vld [vmem:[%s693_s4 + $0x28] sm:$0xff] }
  0x33   :  { %427 = vmatpush3.bf16.msra.mxu0 %v426_v5  ;;  %v432_v10 = vpack.c.bf16 %v245_v9, %v244_v8 }
  0x34   :  { %428 = vmatprep.subr.bf16.mxu0 %v520_v4 }
  0x37   :  { %430 = vmatpush3.bf16.msra.mxu0 %v429_v7 }
  0x38   :  { %431 = vmatprep.subr.bf16.mxu0 %v520_v4 }
  0x3b   :  { %433 = vmatpush3.bf16.msra.mxu0 %v432_v10 }
  0x3c   :  { %434 = vmatprep.subr.bf16.mxu0 %v520_v4 }
  0xa0   :  { %v89_v15 = vpop.permute.xlu0 %88  ;;  %v114_v18 = vpop.permute.xlu1 %113 }
  0xa1   :  { %v91_v17 = vadd.f32 %v89_v15, %v77_v12  ;;  %v247_v12 = vld [vmem:[%s693_s4 + $0x38] sm:$0xff]  ;;  %v248_v15 = vld [vmem:[%s693_s4 + $0x40] sm:$0xff] }
  0xa2   :  { %v435_v13 = vpack.c.bf16 %v247_v12, %v246_v11 }
  0xa3   :  { %v104_v20 = vadd.f32 %v100_v14, %v91_v17 }
  0xa4   :  { %v94_v22 = vpop.permute.xlu0 %93  ;;  %v119_v25 = vpop.permute.xlu1 %118  ;;  %436 = vmatpush3.bf16.msra.mxu0 %v435_v13 }
  0xa5   :  { %v116_v23 = vadd.f32 %v114_v18, %v104_v20  ;;  %v96_v24 = vadd.f32 %v94_v22, %v80_v19  ;;  %437 = vmatprep.subr.bf16.mxu0 %v520_v4  ;;  %v438_v18 = vpack.c.bf16 %v249_v16, %v248_v15  ;;  %v251_v22 = vld [vmem:[%s693_s4 + $0x58] sm:$0xff] }
  0xa7   :  { %v105_v26 = vadd.f32 %v103_v21, %v96_v24  ;;  %v124_v27 = vsel %vm123_vm0, %v116_v23, 0.0  ;;  %v250_v21 = vld [vmem:[%s693_s4 + $0x50] sm:$0xff] }
  0xa8   :  { %125 = vadd.xlane.f32.xlu0 %v124_v27  ;;  %439 = vmatpush3.bf16.msra.mxu0 %v438_v18 }
  0xa9   :  { %v121_v28 = vadd.f32 %v119_v25, %v105_v26  ;;  %440 = vmatprep.subr.bf16.mxu0 %v520_v4  ;;  %v441_v25 = vpack.c.bf16 %v251_v22, %v250_v21 }
  0xab   :  { %v138_v29 = vsel %vm123_vm0, %v121_v28, 0.0  ;;  %v159_v36 = vrot.slane %v121_v28, %v158_v35  ;;  %v252_v28 = vld [vmem:[%s693_s4 + $0x60] sm:$0xff]  ;;  %v254_v35 = vld [vmem:[%s693_s4 + $0x70] sm:$0xff] }
  0xac   :  { %139 = vadd.xlane.f32.xlu1 %v138_v29  ;;  %442 = vmatpush3.bf16.msra.mxu0 %v441_v25  ;;  %v253_v29 = vld [vmem:[%s693_s4 + $0x68] sm:$0xff] }
  0xad   :  { %443 = vmatprep.subr.bf16.mxu0 %v520_v4  ;;  %v444_v32 = vpack.c.bf16 %v253_v29, %v252_v28 }
  0xb0   :  { %445 = vmatpush3.bf16.msra.mxu0 %v444_v32 }
  0xb1   :  { %446 = vmatprep.subr.bf16.mxu0 %v520_v4 }
  0xbe   :  { %160 = vrot.lane.b32.xlu0 %v159_v36, %s518_s25  ;;  %v255_v36 = vld [vmem:[%s693_s4 + $0x78] sm:$0xff]  ;;  %s214_s4 = sld [smem:[#allocation7]] }
 0x135   :  { %v126_v37 = vpop.xlane.xlu0 %125 }
 0x136   :  { %v127_v38 = vrot.slane %v126_v37, 4 }
 0x138   :  { %v128_v39 = vadd.f32 %v127_v38, %v126_v37  ;;  %v447_v38 = vpack.c.bf16 %v255_v36, %v254_v35 }
 0x139   :  { %v140_v40 = vpop.xlane.xlu1 %139  ;;  %v161_v41 = vpop.permute.xlu0 %160 }
 0x13a   :  { %v129_v42 = vrot.slane %v128_v39, 2  ;;  %v141_v43 = vrot.slane %v140_v40, 4  ;;  %v164_v44 = vsel %vm163_vm1, %v116_v23, %v161_v41  ;;  %448 = vmatpush3.bf16.msra.mxu0 %v447_v38 }
 0x13b   :  { %166 = vst [vmem:[#allocation2] sm:$0x3] %v164_v44 }
 0x13c   :  { %v142_v45 = vadd.f32 %v141_v43, %v140_v40  ;;  %v130_v46 = vadd.f32 %v129_v42, %v128_v39  ;;  %v522_v39 = vmov 0.0  }
 0x13d   :  { %422 = vmatprep.mubr.msk.f32.mxu0 %vm521_vm5, %v522_v39 }
 0x13e   :  { %v143_v47 = vrot.slane %v142_v45, 2  ;;  %v131_v48 = vrot.slane %v130_v46, 1 }
 0x140   :  { %v132_v49 = vadd.f32 %v131_v48, %v130_v46  ;;  %v144_v50 = vadd.f32 %v143_v47, %v142_v45 }
 0x142   :  { %449 = vpush %v132_v49  ;;  %v145_v51 = vrot.slane %v144_v50, 1  ;;  %v606_v58 = vld [vmem:[#allocation2] sm:$0x3] }
 0x144   :  { %v146_v52 = vadd.f32 %v145_v51, %v144_v50 }
 0x146   :  { %451 = vpush %v146_v52 }
 0x173   :  { %s588_s29 = spop %449 }
 0x174   :  { %s171_s30 = smul.f32 0.0078125, %s588_s29 }
 0x176   :  { %v182_v55 = vstv %s171_s30 }
 0x177   :  { %s593_s9 = spop %451 }
 0x178   :  { %s173_s10 = smul.f32 0.0078125, %s593_s9 }
 0x17a   :  { %v180_v54 = vstv %s173_s10 }
 0x17b   :  { %v181_v56 = vsel %vm177_vm2, %v180_v54, 0.0 }
 0x17c   :  { %v183_v57 = vsel %vm176_vm3, %v182_v55, %v181_v56 }
 0x17d   :  { %v185_v59 = vsub.f32 %v606_v58, %v183_v57  ;;  %v371_v57 = vld [vmem:[%s694_s5] ss:$0 sm:$0xff] }
 0x17f   :  { %v186_v60 = vmul.f32 %v185_v59, %v185_v59 }
 0x181   :  { %v187_v61 = vsel %vm176_vm3, %v186_v60, 0.0  ;;  %v200_v63 = vsel %vm177_vm2, %v186_v60, 0.0 }
 0x182   :  { %v189_v62 = vsel %vm188_vm4, %v187_v61, 0.0  ;;  %v201_v0 = vsel %vm188_vm4, %v200_v63, 0.0 }
 0x183   :  { %190 = vadd.xlane.f32.xlu1 %v189_v62  ;;  %v372_v62 = vld [vmem:[%s695_s6] ss:$0 sm:$0xff] }
 0x187   :  { %202 = vadd.xlane.f32.xlu1 %v201_v0 }
 0x210   :  { %v191_v14 = vpop.xlane.xlu1 %190 }
 0x211   :  { %v192_v17 = vrot.slane %v191_v14, 4 }
 0x213   :  { %v193_v19 = vadd.f32 %v192_v17, %v191_v14 }
 0x214   :  { %v203_v20 = vpop.xlane.xlu1 %202 }
 0x215   :  { %v194_v23 = vrot.slane %v193_v19, 2  ;;  %v204_v24 = vrot.slane %v203_v20, 4 }
 0x217   :  { %v205_v26 = vadd.f32 %v204_v24, %v203_v20  ;;  %v195_v27 = vadd.f32 %v194_v23, %v193_v19 }
 0x219   :  { %v206_v30 = vrot.slane %v205_v26, 2  ;;  %v196_v31 = vrot.slane %v195_v27, 1 }
 0x21b   :  { %v197_v33 = vadd.f32 %v196_v31, %v195_v27  ;;  %v207_v34 = vadd.f32 %v206_v30, %v205_v26 }
 0x21d   :  { %453 = vpush %v197_v33  ;;  %v208_v37 = vrot.slane %v207_v34, 1 }
 0x21f   :  { %v209_v40 = vadd.f32 %v208_v37, %v207_v34 }
 0x221   :  { %455 = vpush %v209_v40 }
 0x24e   :  { %s454_s19 = spop %453 }
 0x24f   :  { %s212_s20 = smul.f32 0.0078125, %s454_s19 }
 0x251   :  { %s215_s21 = sadd.f32 1e-05, %s212_s20 }
 0x252   :  { %s456_s3 = spop %455 }
 0x253   :  { %v216_v41 = vstv %s215_s21  ;;  %s213_s22 = smul.f32 0.0078125, %s456_s3 }
 0x254   :  { %469 = vrsqrt.f32 %v216_v41 }
 0x255   :  { %s221_s23 = sadd.f32 1e-05, %s213_s22 }
 0x257   :  { %v222_v42 = vstv %s221_s23 }
 0x258   :  { %471 = vrsqrt.f32 %v222_v42 }
 0x25e   :  { %v470_v43 = vpop.eup %469 }
 0x25f   :  { %457 = vpush %v470_v43 }
 0x262   :  { %v472_v44 = vpop.eup %471 }
 0x263   :  { %459 = vpush %v472_v44 }
 0x290   :  { %s458_s25 = spop %457 }
 0x291   :  { %s219_s27 = smul.f32 %s458_s25, %s214_s4 }
 0x293   :  { %s227_s28 = smul.f32 %s219_s27, %s171_s30  ;;  %v234_v46 = vstv %s219_s27 }
 0x294   :  { %s460_s11 = spop %459 }
 0x295   :  { %s225_s12 = smul.f32 %s460_s11, %s369_s24  ;;  %s228_s2 = ssub.f32 %s226_s26, %s227_s28 }
 0x297   :  { %s230_s13 = smul.f32 %s225_s12, %s173_s10  ;;  %v232_v45 = vstv %s225_s12  ;;  %v238_v50 = vstv %s228_s2 }
 0x298   :  { %v233_v47 = vsel %vm177_vm2, %v232_v45, 0.0 }
 0x299   :  { %s231_s1 = ssub.f32 %s370_s0, %s230_s13  ;;  %v235_v48 = vsel %vm176_vm3, %v234_v46, %v233_v47 }
 0x29a   :  { %v259_v52 = vmul.f32 %v235_v48, %v606_v58 }
 0x29b   :  { %v236_v49 = vstv %s231_s1 }
 0x29c   :  { %v237_v51 = vsel %vm177_vm2, %v236_v49, 0.0 }
 0x29d   :  { %v239_v54 = vsel %vm176_vm3, %v238_v50, %v237_v51 }
 0x29e   :  { %v260_v55 = vadd.f32 %v259_v52, %v239_v54 }
 0x2a0   :  { %v261_v56 = vmax.f32 %v260_v55, 0.0 }
 0x2a2   :  { %423 = vmatmul.mubr.f32.vlgmr.msra.gmra.mrb[0].mxu0 %v261_v56 }
 0x375   :  { %v334_v59 = vpop.f32.mrb[0].mxu0 }
 0x376   :  { %v335_v60 = vadd.f32 %v371_v57, %v334_v59  ;;  %v424_v61 = vpop.f32.mrb[1].mxu0 }
 0x378   :  { %v338_v63 = vmax.f32 %v335_v60, 0.0 }
 0x37a   :  { %v345_v0 = vmul.f32 %v372_v62, %v338_v63 }
 0x37c   :  { %v346_v58 = vsel %vm188_vm4, %v345_v0, 0.0 }
 0x37d   :  { %347 = vadd.xlane.f32.xlu1 %v346_v58 }
 0x40a   :  { %v348_v1 = vpop.xlane.xlu1 %347 }
 0x40b   :  { %v350_v2 = vadd.f32 %v349_v53, %v348_v1 }
 0x40d   :  { %473 = vtanh.f32 %v350_v2 }
 0x417   :  { %v474_v3 = vpop.eup %473 }
 0x418   :  { %353 = vst.msk [vmem:[%s697_s8] sm:$0x3] %vm352_vm6, %v474_v3 }
 0x419   :  { %358 = vsyncpa [#allocation6], 1 }
 0x41a   :  { %359 = vsyncpa [#allocation8], 1 }

</bundles_post_ra>
